<compile_context>
chip_gen: v7x
topology: tpu7x:2x2x1
jax: 0.10.0
libtpu: 0.0.40
codegen_flags: <defaults>
</compile_context>

<pallas_src>
import jax
import jax.numpy as jnp
from jax.experimental import pallas as pl
from jax.experimental.pallas import tpu as pltpu


def beta_layer_kernel(x_ref, w_ref, b_ref, o_ref):
    """One N-tile of beta = stock_latent @ weight.T + bias.

    x_ref: (TILE_N, H)  activation tile (pipelined)
    w_ref: (K, H)       full weight, VMEM-resident across grid steps
    b_ref: (1, K)       full bias,   VMEM-resident across grid steps
    o_ref: (TILE_N, K)  output tile
    """
    # Contract on H of both operands: x[n, h] * w[k, h] -> [n, k].
    # This matches nn.Linear semantics without transposing the weight.
    acc = jax.lax.dot_general(
        x_ref[...],
        w_ref[...],
        dimension_numbers=(((1,), (1,)), ((), ())),
        preferred_element_type=jnp.float32,
    )
    o_ref[...] = (acc + b_ref[...]).astype(o_ref.dtype)


def beta_layer(stock_latent, weight, bias, *, tile_n=1024):
    """Pallas implementation of BetaLayer.forward.

    stock_latent: [N, H] float32
    weight:       [K, H] float32  (PyTorch nn.Linear weight layout, used as-is)
    bias:         [K]    float32
    returns beta: [N, K] float32
    """
    N, H = stock_latent.shape
    K, H2 = weight.shape
    assert H == H2, "weight hidden dim must match stock_latent hidden dim"
    b2d = bias.reshape(1, K)

    dtype_bytes = jnp.dtype(stock_latent.dtype).itemsize

    # Size the N tile against a conservative VMEM budget. Double-buffered
    # x + out tiles dominate: 2 * tile_n * (H + K) * bytes, plus the resident
    # K*H weight. 16 MiB keeps us well inside v7x's 32 MiB scoped default.
    vmem_budget = 16 * 1024 * 1024
    tile_cap = max(8, vmem_budget // (2 * dtype_bytes * (H + K)))
    tile_n = min(tile_n, tile_cap, N)
    if tile_n != N:
        # Block second-to-last dim must be a multiple of 8 (f32 sublane)
        # unless it equals the full array extent.
        tile_n = max(8, (tile_n // 8) * 8)
    grid_n = pl.cdiv(N, tile_n)

    cost = pl.CostEstimate(
        flops=2 * N * H * K,
        transcendentals=0,
        bytes_accessed=dtype_bytes * (N * H + K * H + K + N * K),
    )

    return pl.pallas_call(
        beta_layer_kernel,
        out_shape=jax.ShapeDtypeStruct((N, K), stock_latent.dtype),
        grid_spec=pltpu.PrefetchScalarGridSpec(
            num_scalar_prefetch=0,
            grid=(grid_n,),
            in_specs=[
                # x: tiled along N -> double-buffered HBM<->VMEM pipelining.
                pl.BlockSpec((tile_n, H), lambda i: (i, 0)),
                # weight / bias: grid-invariant, DMA'd once, stay resident.
                pl.BlockSpec((K, H), lambda i: (0, 0)),
                pl.BlockSpec((1, K), lambda i: (0, 0)),
            ],
            out_specs=pl.BlockSpec((tile_n, K), lambda i: (i, 0)),
        ),
        compiler_params=pltpu.CompilerParams(
            # Independent N tiles -> megacore sharding on v7x; neutral on
            # single-TensorCore v5e/v6e.
            dimension_semantics=("parallel",),
        ),
        cost_estimate=cost,
    )(stock_latent, weight, b2d)


if __name__ == "__main__":
    # Small shapes consistent with the module: N stocks, hidden_dim, factor_dims.
    N, hidden_dim, factor_dims = 256, 32, 16

    key = jax.random.PRNGKey(0)
    k_x, k_w, k_b = jax.random.split(key, 3)

    # Deterministic parameter init (synthetic; mimics nn.Linear uniform range).
    bound = 1.0 / (hidden_dim ** 0.5)
    weight = jax.random.uniform(
        k_w, (factor_dims, hidden_dim), jnp.float32, -bound, bound)
    bias = jax.random.uniform(
        k_b, (factor_dims,), jnp.float32, -bound, bound)
    stock_latent = jax.random.normal(k_x, (N, hidden_dim), jnp.float32)

    # tile_n=64 -> 4-step pipelined grid (exercises resident weight/bias too).
    beta = beta_layer(stock_latent, weight, bias, tile_n=64)
    beta = jax.block_until_ready(beta)

    # Reference check in plain JAX (nn.Linear semantics: x @ W.T + b).
    ref = stock_latent @ weight.T + bias
    assert beta.shape == (N, factor_dims)
    assert jnp.allclose(beta, ref, atol=1e-5, rtol=1e-5), float(
        jnp.max(jnp.abs(beta - ref)))

    print("KERNEL_OK")
</pallas_src>

<mosaic_0001>
module attributes {stable_mosaic.version = 11 : i64} {
  func.func @beta_layer_kernel(%arg0: i32, %arg1: memref<64x32xf32, #tpu.memory_space<vmem>>, %arg2: memref<16x32xf32, #tpu.memory_space<vmem>>, %arg3: memref<1x16xf32, #tpu.memory_space<vmem>>, %arg4: memref<64x16xf32, #tpu.memory_space<vmem>>) attributes {dimension_semantics = [#tpu.dimension_semantics<parallel>], iteration_bounds = array<i64: 4>, scalar_prefetch = 0 : i64, scratch_operands = 0 : i64, tpu.core_type = #tpu.core_type<tc>, window_params = [{transform_indices = @transform_0, window_bounds = array<i64: 64, 32>}, {pipeline_mode = #tpu.pipeline_mode<synchronous>, transform_indices = @transform_1, window_bounds = array<i64: 16, 32>}, {pipeline_mode = #tpu.pipeline_mode<synchronous>, transform_indices = @transform_2, window_bounds = array<i64: 1, 16>}, {transform_indices = @transform_3, window_bounds = array<i64: 64, 16>}]} {
    %c0 = arith.constant 0 : index
    %c0_0 = arith.constant 0 : index
    %0 = vector.load %arg1[%c0, %c0_0] : memref<64x32xf32, #tpu.memory_space<vmem>>, vector<64x32xf32>
    %c0_1 = arith.constant 0 : index
    %c0_2 = arith.constant 0 : index
    %1 = vector.load %arg2[%c0_1, %c0_2] : memref<16x32xf32, #tpu.memory_space<vmem>>, vector<16x32xf32>
    %cst = arith.constant dense<0.000000e+00> : vector<64x16xf32>
    %2 = tpu.matmul %0, %1, %cst {dimension_numbers = #tpu.dot_dimension_numbers<[1], [1], [0], [0], [0, 0, 1, 0], [], []>} : vector<64x32xf32>, vector<16x32xf32>, vector<64x16xf32> -> vector<64x16xf32>
    %c0_3 = arith.constant 0 : index
    %c0_4 = arith.constant 0 : index
    %3 = vector.load %arg3[%c0_3, %c0_4] : memref<1x16xf32, #tpu.memory_space<vmem>>, vector<1x16xf32>
    %4 = vector.broadcast %3 : vector<1x16xf32> to vector<64x16xf32>
    %5 = arith.addf %2, %4 : vector<64x16xf32>
    %c0_5 = arith.constant 0 : index
    %c0_6 = arith.constant 0 : index
    %6 = vector.load %arg4[%c0_5, %c0_6] : memref<64x16xf32, #tpu.memory_space<vmem>>, vector<64x16xf32>
    tpu.vector_store %arg4[%c0_5, %c0_6], %5 {strides = array<i32>} : memref<64x16xf32, #tpu.memory_space<vmem>>, vector<64x16xf32>,
    return
  }
  func.func @transform_0(%arg0: i32) -> (i32, i32) {
    %c0_i32 = arith.constant 0 : i32
    %c0_i32_0 = arith.constant 0 : i32
    return %arg0, %c0_i32 : i32, i32
  }
  func.func @transform_1(%arg0: i32) -> (i32, i32) {
    %c0_i32 = arith.constant 0 : i32
    %c0_i32_0 = arith.constant 0 : i32
    %c0_i32_1 = arith.constant 0 : i32
    return %c0_i32, %c0_i32_0 : i32, i32
  }
  func.func @transform_2(%arg0: i32) -> (i32, i32) {
    %c0_i32 = arith.constant 0 : i32
    %c0_i32_0 = arith.constant 0 : i32
    %c0_i32_1 = arith.constant 0 : i32
    return %c0_i32, %c0_i32_0 : i32, i32
  }
  func.func @transform_3(%arg0: i32) -> (i32, i32) {
    %c0_i32 = arith.constant 0 : i32
    %c0_i32_0 = arith.constant 0 : i32
    return %arg0, %c0_i32 : i32, i32
  }
}

</mosaic_0001>

<bundles_post_ra>
// kernel: tpu_custom_call.1
= control target key start
LH: loop header
LB: loop body
LE: loop exit
PB: predicated region body
PF: predicated region fallthrough
CT: control target
= control target key end

     0   :  { %s484_s12 = smov 0   ;;  %s528_s0 = inlined_call_operand.vmem [shape: f32[256,32], index: 0, kind: input, shape index: {}]   ;;  %s529_s1 = inlined_call_operand.vmem [shape: f32[16,32], index: 1, kind: input, shape index: {}]   ;;  %s530_s2 = inlined_call_operand.vmem [shape: f32[1,16], index: 2, kind: input, shape index: {}]   ;;  %s531_s3 = inlined_call_operand.vmem [shape: f32[256,16], index: 3, kind: output, shape index: {}]  }
   0x1 LB: > { %s392_s13 = sadd.s32 4294967295, %s462_s12   ;;  %p396_p0 = scmp.ge.s32.totalorder %s462_s12, 1  ;;  %s462_s12 = sphi %s484_s12, %s13_s12  }
   0x2   : > { %p138_p1 = scmp.lt.s32.totalorder %s462_s12, 5 }
   0x4   : > { %p139_p2 = pnand %p396_p0, %p138_p1 }
   0x5   : > { %v182_v0 = vld [vmem:[%s529_s1] sm:$0xff] (!%p139_p2)  ;;  %v183_v1 = vld [vmem:[%s529_s1 + $0x8] sm:$0xff] (!%p139_p2)  ;;  %vm191_vm0 = vcmask (!%p139_p2), 261120   ;;  %s397_s18 = sshll.u32 (!%p139_p2), %s392_s13, 3  ;;  %vm327_vm2 = vcmask (!%p139_p2), 130048  }
   0x6   : > { %142 = sbr.rel (%p139_p2) target bundleno = 239 (0xef), region = 32  ;;  %v440_v2 = vpack.c.bf16 (!%p139_p2), %v183_v1, %v182_v0  ;;  %vm441_vm1 = vmpackc.low (!%p139_p2), %vm191_vm0, %vm191_vm0  ;;  %p163_p3 = scmp.lt.s32.totalorder (!%p139_p2), %s397_s18, 31  ;;  %v401_v11 = vld [vmem:[%s530_s2] ss:$0 sm:$0xff] (!%p139_p2) }
   0x8   : > { %442 = vmatprep.subr.msk.bf16.mxu0 (!%p139_p2), %vm441_vm1, %v440_v2  ;;  %446 = vmatprep.subr.msk.bf16.mxu1 (!%p139_p2), %vm441_vm1, %v440_v2 }
   0x9   : > { %445 = vmatpush3.bf16.xpose.msk.msra.mxu0 (!%p139_p2), %vm441_vm1, %v440_v2  ;;  %447 = vmatpush3.bf16.xpose.msk.msra.mxu1 (!%p139_p2), %vm441_vm1, %v440_v2 }
   0xd   : > { %s533_s18 = smov (!%p163_p3, %s397_s18), 31 }
   0xe   : > { %s398_s19 = sshll.u32 %s533_s18, 3 }
   0xf   : > { %s166_s22 = scalar_lea.vmem %s528_s0, %s398_s19  ;;  %s172_s27 = scalar_lea.vmem %s531_s3, %s398_s19 }
  0x10   : > { %v174_v3 = vld [vmem:[%s166_s22] sm:$0xff]  ;;  %v175_v5 = vld [vmem:[%s166_s22 + $0x8] sm:$0xff]  ;;  %v176_v7 = vld [vmem:[%s166_s22 + $0x10] sm:$0xff] }
  0x11   : > { %v178_v4 = vld [vmem:[%s166_s22 + $0x20] sm:$0xff]  ;;  %428 = vmatprep.mubr.msk.f32.mxu0 %vm191_vm0, %v174_v3  ;;  %v179_v6 = vld [vmem:[%s166_s22 + $0x28] sm:$0xff]  ;;  %v180_v8 = vld [vmem:[%s166_s22 + $0x30] sm:$0xff] }
  0x12   : > { %434 = vmatprep.mubr.msk.f32.mxu1 %vm191_vm0, %v178_v4  ;;  %429 = vmatmul.mubr.msk.f32.vlgmr.msra.gmra.mrb[0].mxu0 %vm191_vm0, %v175_v5  ;;  %v177_v9 = vld [vmem:[%s166_s22 + $0x18] sm:$0xff] }
  0x13   : > { %435 = vmatmul.mubr.msk.f32.vlgmr.msra.gmra.mrb[0].mxu1 %vm191_vm0, %v179_v6  ;;  %431 = vmatprep.mubr.msk.f32.mxu0 %vm191_vm0, %v176_v7  ;;  %v181_v10 = vld [vmem:[%s166_s22 + $0x38] sm:$0xff] }
  0x14   : > { %437 = vmatprep.mubr.msk.f32.mxu1 %vm191_vm0, %v180_v8 }
  0x16   : > { %432 = vmatmul.mubr.msk.f32.gmra.mrb[2].mxu0 %vm191_vm0, %v177_v9 }
  0x17   : > { %438 = vmatmul.mubr.msk.f32.gmra.mrb[2].mxu1 %vm191_vm0, %v181_v10 }
  0xe5   : > { %v430_v12 = vpop.f32.mrb[0].mxu0 }
  0xe6   : > { %v436_v13 = vpop.f32.mrb[0].mxu1  ;;  %v294_v14 = vadd.f32 %v430_v12, %v401_v11  ;;  %v288_v16 = vpop.f32.mrb[1].mxu0 }
  0xe7   : > { %v314_v15 = vadd.f32 %v436_v13, %v401_v11  ;;  %v308_v17 = vpop.f32.mrb[1].mxu1  ;;  %v289_v18 = vadd.f32 %v401_v11, %v288_v16 }
  0xe8   : > { %v309_v19 = vadd.f32 %v401_v11, %v308_v17  ;;  %329 = vst.msk [vmem:[%s172_s27 + $0x8] sm:$0xff] %vm327_vm2, %v294_v14 }
  0xe9   : > { %333 = vst.msk [vmem:[%s172_s27 + $0x28] sm:$0xff] %vm327_vm2, %v314_v15  ;;  %328 = vst.msk [vmem:[%s172_s27] sm:$0xff] %vm327_vm2, %v289_v18  ;;  %v433_v20 = vpop.f32.mrb[2].mxu0 }
  0xea   : > { %332 = vst.msk [vmem:[%s172_s27 + $0x20] sm:$0xff] %vm327_vm2, %v309_v19  ;;  %v439_v21 = vpop.f32.mrb[2].mxu1  ;;  %v304_v22 = vadd.f32 %v433_v20, %v401_v11  ;;  %v298_v24 = vpop.f32.mrb[3].mxu0 }
  0xeb   : > { %v324_v23 = vadd.f32 %v439_v21, %v401_v11  ;;  %v318_v25 = vpop.f32.mrb[3].mxu1  ;;  %v299_v26 = vadd.f32 %v401_v11, %v298_v24 }
  0xec   : > { %v319_v27 = vadd.f32 %v401_v11, %v318_v25  ;;  %331 = vst.msk [vmem:[%s172_s27 + $0x18] sm:$0xff] %vm327_vm2, %v304_v22 }
  0xed   : > { %335 = vst.msk [vmem:[%s172_s27 + $0x38] sm:$0xff] %vm327_vm2, %v324_v23  ;;  %330 = vst.msk [vmem:[%s172_s27 + $0x10] sm:$0xff] %vm327_vm2, %v299_v26 }
  0xee   : > { %334 = vst.msk [vmem:[%s172_s27 + $0x30] sm:$0xff] %vm327_vm2, %v319_v27 }
  0xef PF: > { %s13_s12 = sadd.s32 1, %s462_s12  }
  0xf0   : > { %p10_p4 = scmp.ge.s32.totalorder %s13_s12, 6  }
  0xf2   :  { %12 = sbr.rel (!%p10_p4) target bundleno = 1 (0x1), region = 62 }

</bundles_post_ra>
